<compile_context>
chip_gen: v7x
topology: tpu7x:2x2x1
jax: 0.10.0
libtpu: 0.0.40
codegen_flags: <defaults>
</compile_context>

<pallas_src>
import numpy as np
import jax
import jax.numpy as jnp
from jax.experimental import pallas as pl
from jax.experimental.pallas import tpu as pltpu

_LOG_2PI = float(np.log(2.0 * np.pi))

# On v6e/v7x, setting this to jnp.bfloat16 halves the dominant HBM byte stream
# (the state tiles) and uses the native bf16 MXU path while keeping f32 accumulation.
# Kept at f32 here so the reference check below stays tight.
_MATMUL_DTYPE = jnp.float32


def _mlp_mu(x, w1, b1, w2, b2, w3, b3):
    """Shared 3-layer tanh MLP body -> mu = tanh(raw_logits). Accumulate in f32."""
    h = jnp.tanh(jnp.dot(x.astype(_MATMUL_DTYPE), w1.astype(_MATMUL_DTYPE),
                         preferred_element_type=jnp.float32) + b1)
    h = jnp.tanh(jnp.dot(h.astype(_MATMUL_DTYPE), w2.astype(_MATMUL_DTYPE),
                         preferred_element_type=jnp.float32) + b2)
    raw = jnp.dot(h.astype(_MATMUL_DTYPE), w3.astype(_MATMUL_DTYPE),
                  preferred_element_type=jnp.float32) + b3
    return jnp.tanh(raw)


def hc_ppo_det_kernel(state_ref, w1_ref, b1_ref, w2_ref, b2_ref, w3_ref, b3_ref,
                      mu_ref):
    # deterministic: a == mu, logprob/entropy are constants (computed in wrapper)
    mu_ref[...] = _mlp_mu(state_ref[...], w1_ref[...], b1_ref[...],
                          w2_ref[...], b2_ref[...], w3_ref[...], b3_ref[...])


def hc_ppo_sto_kernel(state_ref, noise_ref,
                      w1_ref, b1_ref, w2_ref, b2_ref, w3_ref, b3_ref,
                      a_ref, mu_ref):
    mu = _mlp_mu(state_ref[...], w1_ref[...], b1_ref[...],
                 w2_ref[...], b2_ref[...], w3_ref[...], b3_ref[...])
    mu_ref[...] = mu
    a_ref[...] = mu + noise_ref[...]   # rsample with std = exp(0) = 1


def init_params(key, input_dim, hidden_dim, a_dim):
    """Deterministic synthetic 'actor' init (orthogonal-ish scaling via normals)."""
    dims = [input_dim] + list(hidden_dim) + [a_dim]
    params = []
    for i, (din, dout) in enumerate(zip(dims[:-1], dims[1:])):
        key, kw = jax.random.split(key)
        scale = 0.01 if i == len(dims) - 2 else 1.0 / np.sqrt(din)
        w = scale * jax.random.normal(kw, (din, dout), jnp.float32)
        b = jnp.zeros((1, dout), jnp.float32)
        params.append((w, b))
    return params


def hc_ppo_forward(state, params, *, deterministic=True, key=None, tile_b=512):
    # Mirror the PyTorch shape handling.
    if state.ndim == 3 or state.ndim == 1:
        state = state[None, ...]
        state = state.reshape(state.shape[0], -1)
    state = state.astype(jnp.float32)

    (w1, b1), (w2, b2), (w3, b3) = params
    B, input_dim = state.shape
    a_dim = w3.shape[1]

    # Batch tile: full array if small (block == full dim is always legal),
    # otherwise a multiple-of-8 pipelined tile.
    TB = B if B <= tile_b else tile_b
    grid = (pl.cdiv(B, TB),)

    state_spec = pl.BlockSpec((TB, input_dim), lambda i: (i, 0))
    row_spec = pl.BlockSpec((TB, a_dim), lambda i: (i, 0))
    # Weights/biases are a few KB -> keep them as full, grid-constant blocks.
    weight_specs = [pl.BlockSpec(p.shape, lambda i: (0, 0))
                    for p in (w1, b1, w2, b2, w3, b3)]

    cparams = pltpu.CompilerParams(
        dimension_semantics=("parallel",),   # let megacore (v7x) split the batch grid
        vmem_limit_bytes=32 << 20,           # keep headroom on v7x's 64 MiB VMEM
    )

    if deterministic:
        mu = pl.pallas_call(
            hc_ppo_det_kernel,
            grid=grid,
            out_shape=jax.ShapeDtypeStruct((B, a_dim), jnp.float32),
            in_specs=[state_spec] + weight_specs,
            out_specs=row_spec,
            compiler_params=cparams,
        )(state, w1, b1, w2, b2, w3, b3)
        a = mu
        quad = jnp.zeros((B,), jnp.float32)          # ||a - mu||^2 == 0
    else:
        assert key is not None, "stochastic forward needs a PRNG key"
        noise = jax.random.normal(key, (B, a_dim), jnp.float32)
        a, mu = pl.pallas_call(
            hc_ppo_sto_kernel,
            grid=grid,
            out_shape=(jax.ShapeDtypeStruct((B, a_dim), jnp.float32),
                       jax.ShapeDtypeStruct((B, a_dim), jnp.float32)),
            in_specs=[state_spec, row_spec] + weight_specs,
            out_specs=(row_spec, row_spec),
            compiler_params=cparams,
        )(state, noise, w1, b1, w2, b2, w3, b3)
        quad = jnp.sum(noise * noise, axis=-1)       # fused by XLA with the RNG draw

    # MVN(mu, I): log_prob(a) = -0.5 * (||a - mu||^2 + k*log(2*pi));
    # entropy = 0.5 * k * (1 + log(2*pi)) is a compile-time constant.
    logprobs = -0.5 * (quad + a_dim * _LOG_2PI)
    probs = jnp.exp(logprobs)
    entropy = jnp.full((B,), 0.5 * a_dim * (1.0 + _LOG_2PI), jnp.float32)

    info = {
        "dist": {"mu": mu, "std": jnp.ones_like(mu)},
        "probs": probs,
        "logprobs": logprobs,
        "entropy": entropy,
    }
    # TODO(synk): discrete (Categorical, is_discrete=True) branch not implemented in
    #             the kernel; the module's default continuous path is covered above.
    return a, info


if __name__ == "__main__":
    input_dim = 16
    hidden_dim = [32, 32]
    a_dim = 5          # num_options + 1

    key = jax.random.PRNGKey(0)
    kp, kx, kx2, kn = jax.random.split(key, 4)

    params = init_params(kp, input_dim, hidden_dim, a_dim)

    def ref_forward(state, params, noise):
        (w1, b1), (w2, b2), (w3, b3) = params
        h = jnp.tanh(state @ w1 + b1)
        h = jnp.tanh(h @ w2 + b2)
        mu = jnp.tanh(h @ w3 + b3)
        a = mu + noise
        lp = -0.5 * (jnp.sum(noise * noise, axis=-1) + a_dim * _LOG_2PI)
        ent = jnp.full((state.shape[0],), 0.5 * a_dim * (1.0 + _LOG_2PI))
        return a, mu, lp, ent

    # ---- small single-tile case (block == full batch) ----
    batch = 2
    state = jax.random.normal(kx, (batch, input_dim), jnp.float32)

    a_det, info_det = hc_ppo_forward(state, params, deterministic=True)
    a_st, info_st = hc_ppo_forward(state, params, deterministic=False, key=kn)
    jax.block_until_ready((a_det, info_det["logprobs"], info_det["entropy"],
                           a_st, info_st["logprobs"]))

    a_ref, mu_ref, lp_ref, ent_ref = ref_forward(
        state, params, jnp.zeros((batch, a_dim), jnp.float32))
    np.testing.assert_allclose(np.asarray(a_det), np.asarray(a_ref),
                               rtol=1e-5, atol=1e-5)
    np.testing.assert_allclose(np.asarray(info_det["logprobs"]), np.asarray(lp_ref),
                               rtol=1e-5, atol=1e-5)
    np.testing.assert_allclose(np.asarray(info_det["entropy"]), np.asarray(ent_ref),
                               rtol=1e-5, atol=1e-5)

    # Stochastic: mu must equal the deterministic mu; logprob consistent with a - mu.
    np.testing.assert_allclose(np.asarray(info_st["dist"]["mu"]), np.asarray(mu_ref),
                               rtol=1e-5, atol=1e-5)
    eps = np.asarray(a_st) - np.asarray(info_st["dist"]["mu"])
    lp_check = -0.5 * ((eps * eps).sum(-1) + a_dim * _LOG_2PI)
    np.testing.assert_allclose(np.asarray(info_st["logprobs"]), lp_check,
                               rtol=1e-5, atol=1e-5)

    # ---- multi-tile case exercising the batch grid (3 tiles of 8 rows) ----
    state2 = jax.random.normal(kx2, (24, input_dim), jnp.float32)
    a_det2, info_det2 = hc_ppo_forward(state2, params, deterministic=True, tile_b=8)
    jax.block_until_ready(a_det2)
    a_ref2, _, lp_ref2, _ = ref_forward(
        state2, params, jnp.zeros((24, a_dim), jnp.float32))
    np.testing.assert_allclose(np.asarray(a_det2), np.asarray(a_ref2),
                               rtol=1e-5, atol=1e-5)
    np.testing.assert_allclose(np.asarray(info_det2["logprobs"]), np.asarray(lp_ref2),
                               rtol=1e-5, atol=1e-5)

    print("KERNEL_OK")
</pallas_src>

<mosaic_0001>
module attributes {stable_mosaic.version = 11 : i64} {
  func.func @hc_ppo_det_kernel(%arg0: i32, %arg1: memref<2x16xf32, #tpu.memory_space<vmem>>, %arg2: memref<16x32xf32, #tpu.memory_space<vmem>>, %arg3: memref<1x32xf32, #tpu.memory_space<vmem>>, %arg4: memref<32x32xf32, #tpu.memory_space<vmem>>, %arg5: memref<1x32xf32, #tpu.memory_space<vmem>>, %arg6: memref<32x5xf32, #tpu.memory_space<vmem>>, %arg7: memref<1x5xf32, #tpu.memory_space<vmem>>, %arg8: memref<2x5xf32, #tpu.memory_space<vmem>>) attributes {dimension_semantics = [#tpu.dimension_semantics<parallel>], iteration_bounds = array<i64: 1>, scalar_prefetch = 0 : i64, scratch_operands = 0 : i64, tpu.core_type = #tpu.core_type<tc>, window_params = [{transform_indices = @transform_0, window_bounds = array<i64: 2, 16>}, {pipeline_mode = #tpu.pipeline_mode<synchronous>, transform_indices = @transform_1, window_bounds = array<i64: 16, 32>}, {pipeline_mode = #tpu.pipeline_mode<synchronous>, transform_indices = @transform_2, window_bounds = array<i64: 1, 32>}, {pipeline_mode = #tpu.pipeline_mode<synchronous>, transform_indices = @transform_3, window_bounds = array<i64: 32, 32>}, {pipeline_mode = #tpu.pipeline_mode<synchronous>, transform_indices = @transform_4, window_bounds = array<i64: 1, 32>}, {pipeline_mode = #tpu.pipeline_mode<synchronous>, transform_indices = @transform_5, window_bounds = array<i64: 32, 5>}, {pipeline_mode = #tpu.pipeline_mode<synchronous>, transform_indices = @transform_6, window_bounds = array<i64: 1, 5>}, {transform_indices = @transform_7, window_bounds = array<i64: 2, 5>}]} {
    %c0 = arith.constant 0 : index
    %c0_0 = arith.constant 0 : index
    %0 = vector.load %arg1[%c0, %c0_0] : memref<2x16xf32, #tpu.memory_space<vmem>>, vector<2x16xf32>
    %c0_1 = arith.constant 0 : index
    %c0_2 = arith.constant 0 : index
    %1 = vector.load %arg2[%c0_1, %c0_2] : memref<16x32xf32, #tpu.memory_space<vmem>>, vector<16x32xf32>
    %c0_3 = arith.constant 0 : index
    %c0_4 = arith.constant 0 : index
    %2 = vector.load %arg3[%c0_3, %c0_4] : memref<1x32xf32, #tpu.memory_space<vmem>>, vector<1x32xf32>
    %c0_5 = arith.constant 0 : index
    %c0_6 = arith.constant 0 : index
    %3 = vector.load %arg4[%c0_5, %c0_6] : memref<32x32xf32, #tpu.memory_space<vmem>>, vector<32x32xf32>
    %c0_7 = arith.constant 0 : index
    %c0_8 = arith.constant 0 : index
    %4 = vector.load %arg5[%c0_7, %c0_8] : memref<1x32xf32, #tpu.memory_space<vmem>>, vector<1x32xf32>
    %c0_9 = arith.constant 0 : index
    %c0_10 = arith.constant 0 : index
    %5 = vector.load %arg6[%c0_9, %c0_10] : memref<32x5xf32, #tpu.memory_space<vmem>>, vector<32x5xf32>
    %c0_11 = arith.constant 0 : index
    %c0_12 = arith.constant 0 : index
    %6 = vector.load %arg7[%c0_11, %c0_12] : memref<1x5xf32, #tpu.memory_space<vmem>>, vector<1x5xf32>
    %cst = arith.constant dense<0.000000e+00> : vector<2x32xf32>
    %7 = tpu.matmul %0, %1, %cst {dimension_numbers = #tpu.dot_dimension_numbers<[1], [0], [0], [1], [0, 0, 1, 1], [], []>} : vector<2x16xf32>, vector<16x32xf32>, vector<2x32xf32> -> vector<2x32xf32>
    %8 = vector.broadcast %2 : vector<1x32xf32> to vector<2x32xf32>
    %9 = arith.addf %7, %8 : vector<2x32xf32>
    %10 = math.tanh %9 : vector<2x32xf32>
    %cst_13 = arith.constant dense<0.000000e+00> : vector<2x32xf32>
    %11 = tpu.matmul %10, %3, %cst_13 {dimension_numbers = #tpu.dot_dimension_numbers<[1], [0], [0], [1], [0, 0, 1, 1], [], []>} : vector<2x32xf32>, vector<32x32xf32>, vector<2x32xf32> -> vector<2x32xf32>
    %12 = vector.broadcast %4 : vector<1x32xf32> to vector<2x32xf32>
    %13 = arith.addf %11, %12 : vector<2x32xf32>
    %14 = math.tanh %13 : vector<2x32xf32>
    %cst_14 = arith.constant dense<0.000000e+00> : vector<2x5xf32>
    %15 = tpu.matmul %14, %5, %cst_14 {dimension_numbers = #tpu.dot_dimension_numbers<[1], [0], [0], [1], [0, 0, 1, 1], [], []>} : vector<2x32xf32>, vector<32x5xf32>, vector<2x5xf32> -> vector<2x5xf32>
    %16 = vector.broadcast %6 : vector<1x5xf32> to vector<2x5xf32>
    %17 = arith.addf %15, %16 : vector<2x5xf32>
    %18 = math.tanh %17 : vector<2x5xf32>
    %c0_15 = arith.constant 0 : index
    %c0_16 = arith.constant 0 : index
    %19 = vector.load %arg8[%c0_15, %c0_16] : memref<2x5xf32, #tpu.memory_space<vmem>>, vector<2x5xf32>
    tpu.vector_store %arg8[%c0_15, %c0_16], %18 {strides = array<i32>} : memref<2x5xf32, #tpu.memory_space<vmem>>, vector<2x5xf32>,
    return
  }
  func.func @transform_0(%arg0: i32) -> (i32, i32) {
    %c0_i32 = arith.constant 0 : i32
    %c0_i32_0 = arith.constant 0 : i32
    return %arg0, %c0_i32 : i32, i32
  }
  func.func @transform_1(%arg0: i32) -> (i32, i32) {
    %c0_i32 = arith.constant 0 : i32
    %c0_i32_0 = arith.constant 0 : i32
    %c0_i32_1 = arith.constant 0 : i32
    return %c0_i32, %c0_i32_0 : i32, i32
  }
  func.func @transform_2(%arg0: i32) -> (i32, i32) {
    %c0_i32 = arith.constant 0 : i32
    %c0_i32_0 = arith.constant 0 : i32
    %c0_i32_1 = arith.constant 0 : i32
    return %c0_i32, %c0_i32_0 : i32, i32
  }
  func.func @transform_3(%arg0: i32) -> (i32, i32) {
    %c0_i32 = arith.constant 0 : i32
    %c0_i32_0 = arith.constant 0 : i32
    %c0_i32_1 = arith.constant 0 : i32
    return %c0_i32, %c0_i32_0 : i32, i32
  }
  func.func @transform_4(%arg0: i32) -> (i32, i32) {
    %c0_i32 = arith.constant 0 : i32
    %c0_i32_0 = arith.constant 0 : i32
    %c0_i32_1 = arith.constant 0 : i32
    return %c0_i32, %c0_i32_0 : i32, i32
  }
  func.func @transform_5(%arg0: i32) -> (i32, i32) {
    %c0_i32 = arith.constant 0 : i32
    %c0_i32_0 = arith.constant 0 : i32
    %c0_i32_1 = arith.constant 0 : i32
    return %c0_i32, %c0_i32_0 : i32, i32
  }
  func.func @transform_6(%arg0: i32) -> (i32, i32) {
    %c0_i32 = arith.constant 0 : i32
    %c0_i32_0 = arith.constant 0 : i32
    %c0_i32_1 = arith.constant 0 : i32
    return %c0_i32, %c0_i32_0 : i32, i32
  }
  func.func @transform_7(%arg0: i32) -> (i32, i32) {
    %c0_i32 = arith.constant 0 : i32
    %c0_i32_0 = arith.constant 0 : i32
    return %arg0, %c0_i32 : i32, i32
  }
}

</mosaic_0001>

<bundles_post_ra>
// kernel: tpu_custom_call.1
= control target key start
LH: loop header
LB: loop body
LE: loop exit
PB: predicated region body
PF: predicated region fallthrough
CT: control target
= control target key end

     0   :  { %12 = vsyncpa [#allocation3], 0  ;;  %s592_s0 = inlined_call_operand.vmem [shape: f32[2,16], index: 0, kind: input, shape index: {}]   ;;  %s593_s1 = inlined_call_operand.vmem [shape: f32[16,32], index: 1, kind: input, shape index: {}]   ;;  %s594_s2 = inlined_call_operand.hbm [shape: f32[1,32], index: 2, kind: input, shape index: {}]   ;;  %s595_s3 = inlined_call_operand.vmem [shape: f32[32,32], index: 3, kind: input, shape index: {}]   ;;  %s596_s4 = inlined_call_operand.hbm [shape: f32[1,32], index: 4, kind: input, shape index: {}]   ;;  %s597_s5 = inlined_call_operand.vmem [shape: f32[32,5], index: 5, kind: input, shape index: {}]   ;;  %s598_s6 = inlined_call_operand.vmem [shape: f32[1,5], index: 6, kind: input, shape index: {}]   ;;  %s599_s7 = inlined_call_operand.hbm [shape: f32[2,5], index: 7, kind: output, shape index: {}]  }
   0x1   :  { %13 = vsyncpa [#allocation6], 0 }
   0x2   :  { %14 = vsyncpa [#allocation4], 0  ;;  %s472_s24 = smov [#allocation2]   ;;  %s473_s26 = smov [#allocation5]  }
   0x3   :  { %s25_s25 = sshll.u32 %s472_s24, 4  ;;  %s37_s27 = sshll.u32 %s473_s26, 4  ;;  %s26_s25 = int_to_ptr.vmem [resolvable:$true] %s25_s25  ;;  %s38_s27 = int_to_ptr.vmem [resolvable:$true] %s37_s27 }
   0x4   :  { %s400_s30 = scalar_lea.hbm %s594_s2, 16 }
   0x5   :  { %p401_p0 = scmp.ne.s32.totalorder %s594_s2, %s400_s30  ;;  %p404_p1 = scmp.lt.u32.totalorder %s400_s30, %s594_s2 }
   0x7   :  { %p406_p2 = pnand %p404_p1, %p401_p0 }
   0x9   :  { %409 = shalt.err (!%p406_p2)
}
   0xa   :  { %s410_s12 = scalar_lea.vmem %s26_s25, 16  ;;  %s414_s13 = scalar_lea.vmem %s26_s25, 32 }
   0xb   :  { %p411_p3 = scmp.ne.s32.totalorder %s26_s25, %s410_s12  ;;  %p415_p4 = scmp.lt.s32.totalorder %s26_s25, %s26_s25 }
   0xc   :  { %p416_p5 = scmp.lt.s32.totalorder %s414_s13, %s410_s12 }
   0xe   :  { %p417_p6 = por %p416_p5, %p415_p4 }
  0x10   :  { %p418_p7 = pnand %p417_p6, %p411_p3 }
  0x12   :  { %421 = shalt.err (!%p418_p7)
}
  0x13   :  { %28 = dma.hbm_to_vmem [thread:$0]  %s594_s2, 16, %s26_s25, [#allocation3]  }
  0x14   :  { %s422_s18 = scalar_lea.hbm %s596_s4, 16 }
  0x15   :  { %p423_p8 = scmp.ne.s32.totalorder %s596_s4, %s422_s18  ;;  %p426_p9 = scmp.lt.u32.totalorder %s422_s18, %s596_s4 }
  0x17   :  { %p428_p10 = pnand %p426_p9, %p423_p8 }
  0x19   :  { %431 = shalt.err (!%p428_p10)
}
  0x1a   :  { %s432_s23 = scalar_lea.vmem %s38_s27, 16  ;;  %s436_s24 = scalar_lea.vmem %s38_s27, 32 }
  0x1b   :  { %p433_p11 = scmp.ne.s32.totalorder %s38_s27, %s432_s23  ;;  %p437_p12 = scmp.lt.s32.totalorder %s38_s27, %s38_s27 }
  0x1c   :  { %p438_p13 = scmp.lt.s32.totalorder %s436_s24, %s432_s23 }
  0x1e   :  { %p439_p0 = por %p438_p13, %p437_p12 }
  0x20   :  { %p440_p1 = pnand %p439_p0, %p433_p11 }
  0x22   :  { %443 = shalt.err (!%p440_p1)
}
  0x23   :  { %40 = dma.hbm_to_vmem [thread:$0]  %s596_s4, 16, %s38_s27, [#allocation6]  }
  0x24   :  { %466 = dma.done.wait [#allocation3], 16  }
  0x25   :  { %467 = vsyncadd [#allocation3], 4294967280 }
  0x26   :  { %468 = dma.done.wait [#allocation6], 16  }
  0x27   :  { %469 = vsyncadd [#allocation6], 4294967280  ;;  %v474_v0 = vmov 0.0|0.0   ;;  %vm475_vm0 = vmmov 0   ;;  %v476_v1 = vmov 0.0   ;;  %v52_v2 = vld [vmem:[%s593_s1] sm:$0xff] }
  0x28   :  { %373 = vmatprep.subr.bf16.mxu0 %v474_v0  ;;  %348 = vmatprep.mubr.msk.f32.mxu0 %vm475_vm0, %v476_v1  ;;  %v53_v3 = vld [vmem:[%s593_s1 + $0x8] sm:$0xff]  ;;  %v51_v5 = vld [vmem:[%s592_s0] sm:$0x3]  ;;  %vm71_vm1 = vcmask 130048   ;;  %v57_v8 = vld [vmem:[%s595_s3 + $0x10] sm:$0xff]  ;;  %vm152_vm2 = vcmask 261120  }
  0x29   :  { %376 = vmatprep.subr.bf16.mxu1 %v474_v0  ;;  %359 = vmatprep.mubr.msk.f32.mxu1 %vm475_vm0, %v476_v1  ;;  %v374_v4 = vpack.c.bf16 %v53_v3, %v52_v2  ;;  %v55_v6 = vld [vmem:[%s595_s3] sm:$0xff]  ;;  %v56_v7 = vld [vmem:[%s595_s3 + $0x8] sm:$0xff]  ;;  %v58_v10 = vld [vmem:[%s595_s3 + $0x18] sm:$0xff]  ;;  %vm307_vm3 = vcmask 33792  }
  0x2a   :  { %v377_v9 = vpack.c.bf16 %v56_v7, %v55_v6  ;;  %v380_v11 = vpack.c.bf16 %v58_v10, %v57_v8  ;;  %v325_v12 = vld [vmem:[#allocation2] ss:$0 sm:$0xff]  ;;  %v61_v18 = vld [vmem:[%s597_s5 + $0x8] sm:$0xff]  ;;  %v62_v19 = vld [vmem:[%s597_s5 + $0x10] sm:$0xff] }
  0x2b   :  { %375 = vmatpush3.bf16.msra.mxu0 %v374_v4  ;;  %v60_v17 = vld [vmem:[%s597_s5] sm:$0xff]  ;;  %v63_v21 = vld [vmem:[%s597_s5 + $0x18] sm:$0xff]  ;;  %s477_s5 = smov [#allocation7]  }
  0x2c   :  { %382 = vmatprep.subr.bf16.mxu0 %v474_v0  ;;  %378 = vmatpush3.bf16.msra.mxu1 %v377_v9  ;;  %v383_v20 = vpack.c.bf16 %v61_v18, %v60_v17  ;;  %v386_v22 = vpack.c.bf16 %v63_v21, %v62_v19  ;;  %v327_v23 = vld [vmem:[#allocation5] ss:$0 sm:$0xff]  ;;  %v329_v28 = vld [vmem:[%s598_s6] ss:$0 sm:$0xff]  ;;  %s315_s23 = sshll.u32 %s477_s5, 4  ;;  %s316_s23 = int_to_ptr.vmem [resolvable:$true] %s315_s23 }
  0x2d   :  { %379 = vmatprep.subr.bf16.mxu1 %v474_v0  ;;  %s444_s24 = scalar_lea.vmem %s316_s23, 32  ;;  %p449_p3 = scmp.lt.s32.totalorder %s316_s23, %s316_s23 }
  0x2e   :  { %349 = vmatmul.mubr.msk.f32.vlgmr.msra.gmra.mrb[0].mxu0 %vm71_vm1, %v51_v5  ;;  %p445_p2 = scmp.ne.s32.totalorder %s316_s23, %s444_s24  ;;  %p450_p4 = scmp.lt.s32.totalorder %s444_s24, %s444_s24 }
  0x2f   :  { %370 = vmatprep.mubr.msk.f32.mxu0 %vm475_vm0, %v476_v1  ;;  %384 = vmatpush3.bf16.msra.mxu0 %v383_v20 }
  0x30   :  { %381 = vmatpush3.bf16.msra.mxu1 %v380_v11  ;;  %385 = vmatprep.subr.bf16.mxu0 %v474_v0  ;;  %p451_p5 = por %p450_p4, %p449_p3 }
  0x32   :  { %p452_p6 = pnand %p451_p5, %p445_p2 }
  0x33   :  { %387 = vmatpush3.bf16.msra.mxu0 %v386_v22 }
 0x101   :  { %v141_v13 = vpop.f32.mrb[0].mxu0 }
 0x102   :  { %v142_v14 = vadd.f32 %v325_v12, %v141_v13  ;;  %v350_v15 = vpop.f32.mrb[1].mxu0 }
 0x104   :  { %394 = vtanh.f32 %v142_v14 }
 0x10e   :  { %v395_v16 = vpop.eup %394 }
 0x10f   :  { %360 = vmatmul.mubr.msk.f32.vlgmr.msra.gmra.mrb[0].mxu1 %vm152_vm2, %v395_v16 }
 0x1e2   :  { %v222_v24 = vpop.f32.mrb[0].mxu1 }
 0x1e3   :  { %v223_v25 = vadd.f32 %v327_v23, %v222_v24  ;;  %v361_v26 = vpop.f32.mrb[1].mxu1 }
 0x1e5   :  { %396 = vtanh.f32 %v223_v25 }
 0x1ef   :  { %v397_v27 = vpop.eup %396 }
 0x1f0   :  { %371 = vmatmul.mubr.msk.f32.vlgmr.msra.gmra.mrb[2].mxu0 %vm152_vm2, %v397_v27 }
 0x2c3   :  { %v302_v29 = vpop.f32.mrb[2].mxu0 }
 0x2c4   :  { %v303_v30 = vadd.f32 %v329_v28, %v302_v29  ;;  %v372_v31 = vpop.f32.mrb[3].mxu0 }
 0x2c6   :  { %398 = vtanh.f32 %v303_v30 }
 0x2d0   :  { %v399_v32 = vpop.eup %398 }
 0x2d1   :  { %308 = vst.msk [vmem:[#allocation7] sm:$0x3] %vm307_vm3, %v399_v32 }
 0x2d2   :  { %455 = shalt.err (!%p452_p6)
}
 0x2d3   :  { %s456_s6 = scalar_lea.hbm %s599_s7, 32 }
 0x2d4   :  { %p457_p7 = scmp.ne.s32.totalorder %s599_s7, %s456_s6  ;;  %p460_p8 = scmp.lt.u32.totalorder %s456_s6, %s599_s7 }
 0x2d6   :  { %p462_p9 = pnand %p460_p8, %p457_p7 }
 0x2d8   :  { %465 = shalt.err (!%p462_p9)
}
 0x2d9   :  { %318 = dma.vmem_to_hbm [thread:$0]  %s316_s23, 32, %s599_s7, [#allocation4]  }
 0x2da   :  { %470 = dma.done.wait [#allocation4], 32  }
 0x2db   :  { %471 = vsyncadd [#allocation4], 4294967264 }
 0x2dc   :  { %322 = vsyncpa [#allocation3], 1 }
 0x2dd   :  { %323 = vsyncpa [#allocation6], 1 }
 0x2de   :  { %324 = vsyncpa [#allocation4], 1 }

</bundles_post_ra>
